<compile_context>
chip_gen: v5e
topology: v5e:2x2
jax: 0.10.0
libtpu: 0.0.40
codegen_flags: <defaults>
</compile_context>

<pallas_src>
import functools

import jax
import jax.numpy as jnp
from jax import lax
from jax.experimental import pallas as pl

EPS = 1e-5
LANE = 128


def _fused_mlp_kernel(x_ref, w_ref, gb_ref, o_ref):
    """Entire MLP forward (L x [Linear -> BatchNorm1d -> ReLU]) in one launch.

    x_ref : (B, F_pad)        bf16  lane-padded input activations
    w_ref : (L, F_pad, F_pad) bf16  zero-padded, pre-transposed weights (F_in, F_out)
    gb_ref: (2L, F_pad)       f32   rows [2l, 2l+1] = (gamma_l, beta_l); pad lanes are 0
    o_ref : (B, F_pad)        f32   lane-dense output (wrapper slices to output_size)
    """
    num_layers = w_ref.shape[0]
    inv_b = jnp.float32(1.0 / x_ref.shape[0])

    h_lo = x_ref[...]                       # bf16 MXU operand (cast once, in the wrapper)
    h = None
    for l in range(num_layers):             # static Python loop -> fully unrolled
        # Linear on the MXU: bf16 operands, f32 accumulate.  Bias intentionally omitted
        # (cancelled by the train-mode batch-mean subtraction below).
        z = jnp.dot(h_lo, w_ref[l], preferred_element_type=jnp.float32)   # (B, F_pad) f32

        # BatchNorm1d train-mode stats in one sweep: two independent XLU reduces.
        s1 = jnp.sum(z, axis=0, keepdims=True)
        s2 = jnp.sum(z * z, axis=0, keepdims=True)
        mean = s1 * inv_b
        var = s2 * inv_b - mean * mean      # biased batch variance (E[z^2] - mean^2)

        gamma = gb_ref[2 * l:2 * l + 1, :]  # (1, F_pad), static slices
        beta = gb_ref[2 * l + 1:2 * l + 2, :]

        # Fold BN affine into one per-feature scale/shift.  Pad lanes: gamma=beta=0
        # -> scale=shift=0 -> padded columns stay exactly zero through every layer.
        scale = gamma * lax.rsqrt(var + EPS)          # rsqrt -> EUP slot
        shift = beta - scale * mean
        h = jnp.maximum(z * scale + shift, 0.0)       # f32 elementwise on the VPU

        if l + 1 < num_layers:
            h_lo = h.astype(jnp.bfloat16)             # next layer's MXU operand

    o_ref[...] = h


def _full_spec(shape):
    return pl.BlockSpec(shape, lambda: (0,) * len(shape))


def mlp_forward_pallas(x_pad, w_packed, gb_packed):
    """Single fused pallas_call over all layers (no grid: everything fits in VMEM)."""
    B, f_pad = x_pad.shape
    return pl.pallas_call(
        _fused_mlp_kernel,
        out_shape=jax.ShapeDtypeStruct((B, f_pad), jnp.float32),
        in_specs=[_full_spec(x_pad.shape),
                  _full_spec(w_packed.shape),
                  _full_spec(gb_packed.shape)],
        out_specs=_full_spec((B, f_pad)),
    )(x_pad, w_packed, gb_packed)


@functools.partial(jax.jit, static_argnames=("output_size",))
def mlp_forward(x, w_packed, gb_packed, *, output_size):
    assert x.ndim == 2
    B, f_in = x.shape
    f_pad = w_packed.shape[1]
    # Lane-pad to 128 and cast the MXU operand to bf16 once, outside the layer loop.
    x_pad = jnp.pad(x.astype(jnp.bfloat16), ((0, 0), (0, f_pad - f_in)))
    out_pad = mlp_forward_pallas(x_pad, w_packed, gb_packed)
    return out_pad[:, :output_size]


def _round_up(n, m):
    return (n + m - 1) // m * m


def init_mlp_params(key, input_size, hidden_size, output_size, num_hiddens):
    """Deterministic init mirroring the PyTorch module structure.

    Weights are generated in (F_in, F_out) layout (pre-transposed), cast to bf16, and
    packed (zero-padded) into a single (L, F_pad, F_pad) array.  gamma/beta are packed
    into a single (2L, F_pad) f32 array; pad lanes are zero.  The Linear bias is not
    materialized (cancelled by train-mode BatchNorm).
    """
    if num_hiddens == 0:
        dims = [(input_size, output_size)]
    else:
        dims = ([(input_size, hidden_size)]
                + [(hidden_size, hidden_size)] * (num_hiddens - 1)
                + [(hidden_size, output_size)])
    num_layers = len(dims)
    f_pad = _round_up(max(max(d) for d in dims), LANE)

    w_packed = jnp.zeros((num_layers, f_pad, f_pad), jnp.bfloat16)
    gb_packed = jnp.zeros((2 * num_layers, f_pad), jnp.float32)
    for l, (f_in, f_out) in enumerate(dims):
        key, kw = jax.random.split(key)
        bound = 1.0 / float(f_in) ** 0.5
        w = jax.random.uniform(kw, (f_in, f_out), jnp.float32, -bound, bound)
        w_packed = w_packed.at[l, :f_in, :f_out].set(w.astype(jnp.bfloat16))
        gb_packed = gb_packed.at[2 * l, :f_out].set(1.0)   # gamma=1; beta row stays 0
    return w_packed, gb_packed, dims


def _reference_forward(x, w_packed, gb_packed, dims):
    """Pure-JAX reference with literal PyTorch train-mode BN semantics.

    Uses the same bf16 matmul operands as the kernel but the two-pass biased variance and
    unfolded affine; differences vs. the kernel come from bf16 rounding of inter-layer
    activations and the E[z^2]-mean^2 refactoring (both small at these magnitudes).
    """
    h = x
    for l, (f_in, f_out) in enumerate(dims):
        w = w_packed[l, :f_in, :f_out]
        z = jnp.dot(h.astype(jnp.bfloat16), w, preferred_element_type=jnp.float32)
        mean = jnp.mean(z, axis=0, keepdims=True)
        var = jnp.mean((z - mean) ** 2, axis=0, keepdims=True)
        gamma = gb_packed[2 * l, :f_out][None, :]
        beta = gb_packed[2 * l + 1, :f_out][None, :]
        h = jnp.maximum(gamma * (z - mean) * lax.rsqrt(var + EPS) + beta, 0.0)
    return h


if __name__ == "__main__":
    # Small shapes consistent with the module: batch=8, in=64, hidden=32, out=16,
    # num_hiddens=2 -> 3 SingleLayerPerceptron layers fused into one kernel.
    key = jax.random.PRNGKey(0)
    kx, kp = jax.random.split(key)

    B, input_size, hidden_size, output_size, num_hiddens = 8, 64, 32, 16, 2
    x = jax.random.normal(kx, (B, input_size), jnp.float32)
    w_packed, gb_packed, dims = init_mlp_params(kp, input_size, hidden_size,
                                                output_size, num_hiddens)

    out = mlp_forward(x, w_packed, gb_packed, output_size=output_size)
    out = jax.block_until_ready(out)

    assert out.shape == (B, output_size)
    assert bool(jnp.all(jnp.isfinite(out)))

    ref = _reference_forward(x, w_packed, gb_packed, dims)
    # Tolerance covers bf16 rounding of inter-layer activations (structural bugs would
    # produce O(1) errors, far above this).
    assert bool(jnp.allclose(out, ref, rtol=2e-2, atol=2e-2))

    print("KERNEL_OK")
</pallas_src>

<mosaic_0001>
module attributes {stable_mosaic.version = 11 : i64} {
  func.func @_fused_mlp_kernel(%arg0: memref<8x128xbf16, #tpu.memory_space<vmem>>, %arg1: memref<3x128x128xbf16, #tpu.memory_space<vmem>>, %arg2: memref<6x128xf32, #tpu.memory_space<vmem>>, %arg3: memref<8x128xf32, #tpu.memory_space<vmem>>) attributes {dimension_semantics = [], scalar_prefetch = 0 : i64, scratch_operands = 0 : i64, tpu.core_type = #tpu.core_type<tc>} {
    %c0 = arith.constant 0 : index
    %c0_0 = arith.constant 0 : index
    %0 = vector.load %arg0[%c0, %c0_0] : memref<8x128xbf16, #tpu.memory_space<vmem>>, vector<8x128xbf16>
    %c0_1 = arith.constant 0 : index
    %c0_2 = arith.constant 0 : index
    %c0_3 = arith.constant 0 : index
    %1 = vector.load %arg1[%c0_1, %c0_2, %c0_3] : memref<3x128x128xbf16, #tpu.memory_space<vmem>>, vector<1x128x128xbf16>
    %2 = vector.shape_cast %1 : vector<1x128x128xbf16> to vector<128x128xbf16>
    %cst = arith.constant dense<0.000000e+00> : vector<8x128xf32>
    %3 = tpu.matmul %0, %2, %cst {dimension_numbers = #tpu.dot_dimension_numbers<[1], [0], [0], [1], [0, 0, 1, 1], [], []>} : vector<8x128xbf16>, vector<128x128xbf16>, vector<8x128xf32> -> vector<8x128xf32>
    %cst_4 = arith.constant dense<0.000000e+00> : vector<128xf32>
    %4 = vector.multi_reduction <add>, %3, %cst_4 [0] : vector<8x128xf32> to vector<128xf32>
    %5 = vector.shape_cast %4 : vector<128xf32> to vector<1x128xf32>
    %6 = arith.mulf %3, %3 : vector<8x128xf32>
    %cst_5 = arith.constant dense<0.000000e+00> : vector<128xf32>
    %7 = vector.multi_reduction <add>, %6, %cst_5 [0] : vector<8x128xf32> to vector<128xf32>
    %8 = vector.shape_cast %7 : vector<128xf32> to vector<1x128xf32>
    %cst_6 = arith.constant 1.250000e-01 : f32
    %9 = vector.broadcast %cst_6 : f32 to vector<1x128xf32>
    %10 = arith.mulf %5, %9 : vector<1x128xf32>
    %cst_7 = arith.constant 1.250000e-01 : f32
    %11 = vector.broadcast %cst_7 : f32 to vector<1x128xf32>
    %12 = arith.mulf %8, %11 : vector<1x128xf32>
    %13 = arith.mulf %10, %10 : vector<1x128xf32>
    %14 = arith.subf %12, %13 : vector<1x128xf32>
    %c0_8 = arith.constant 0 : index
    %c0_9 = arith.constant 0 : index
    %15 = vector.load %arg2[%c0_8, %c0_9] : memref<6x128xf32, #tpu.memory_space<vmem>>, vector<1x128xf32>
    %c1 = arith.constant 1 : index
    %c0_10 = arith.constant 0 : index
    %16 = vector.load %arg2[%c1, %c0_10] : memref<6x128xf32, #tpu.memory_space<vmem>>, vector<1x128xf32>
    %cst_11 = arith.constant 9.99999974E-6 : f32
    %17 = vector.broadcast %cst_11 : f32 to vector<1x128xf32>
    %18 = arith.addf %14, %17 : vector<1x128xf32>
    %19 = math.rsqrt %18 : vector<1x128xf32>
    %20 = arith.mulf %15, %19 : vector<1x128xf32>
    %21 = arith.mulf %20, %10 : vector<1x128xf32>
    %22 = arith.subf %16, %21 : vector<1x128xf32>
    %23 = vector.broadcast %20 : vector<1x128xf32> to vector<8x128xf32>
    %24 = arith.mulf %3, %23 : vector<8x128xf32>
    %25 = vector.broadcast %22 : vector<1x128xf32> to vector<8x128xf32>
    %26 = arith.addf %24, %25 : vector<8x128xf32>
    %cst_12 = arith.constant 0.000000e+00 : f32
    %27 = vector.broadcast %cst_12 : f32 to vector<8x128xf32>
    %28 = arith.maximumf %26, %27 : vector<8x128xf32>
    %29 = arith.truncf %28 : vector<8x128xf32> to vector<8x128xbf16>
    %c1_13 = arith.constant 1 : index
    %c0_14 = arith.constant 0 : index
    %c0_15 = arith.constant 0 : index
    %30 = vector.load %arg1[%c1_13, %c0_14, %c0_15] : memref<3x128x128xbf16, #tpu.memory_space<vmem>>, vector<1x128x128xbf16>
    %31 = vector.shape_cast %30 : vector<1x128x128xbf16> to vector<128x128xbf16>
    %cst_16 = arith.constant dense<0.000000e+00> : vector<8x128xf32>
    %32 = tpu.matmul %29, %31, %cst_16 {dimension_numbers = #tpu.dot_dimension_numbers<[1], [0], [0], [1], [0, 0, 1, 1], [], []>} : vector<8x128xbf16>, vector<128x128xbf16>, vector<8x128xf32> -> vector<8x128xf32>
    %cst_17 = arith.constant dense<0.000000e+00> : vector<128xf32>
    %33 = vector.multi_reduction <add>, %32, %cst_17 [0] : vector<8x128xf32> to vector<128xf32>
    %34 = vector.shape_cast %33 : vector<128xf32> to vector<1x128xf32>
    %35 = arith.mulf %32, %32 : vector<8x128xf32>
    %cst_18 = arith.constant dense<0.000000e+00> : vector<128xf32>
    %36 = vector.multi_reduction <add>, %35, %cst_18 [0] : vector<8x128xf32> to vector<128xf32>
    %37 = vector.shape_cast %36 : vector<128xf32> to vector<1x128xf32>
    %cst_19 = arith.constant 1.250000e-01 : f32
    %38 = vector.broadcast %cst_19 : f32 to vector<1x128xf32>
    %39 = arith.mulf %34, %38 : vector<1x128xf32>
    %cst_20 = arith.constant 1.250000e-01 : f32
    %40 = vector.broadcast %cst_20 : f32 to vector<1x128xf32>
    %41 = arith.mulf %37, %40 : vector<1x128xf32>
    %42 = arith.mulf %39, %39 : vector<1x128xf32>
    %43 = arith.subf %41, %42 : vector<1x128xf32>
    %c2 = arith.constant 2 : index
    %c0_21 = arith.constant 0 : index
    %44 = vector.load %arg2[%c2, %c0_21] : memref<6x128xf32, #tpu.memory_space<vmem>>, vector<1x128xf32>
    %c3 = arith.constant 3 : index
    %c0_22 = arith.constant 0 : index
    %45 = vector.load %arg2[%c3, %c0_22] : memref<6x128xf32, #tpu.memory_space<vmem>>, vector<1x128xf32>
    %cst_23 = arith.constant 9.99999974E-6 : f32
    %46 = vector.broadcast %cst_23 : f32 to vector<1x128xf32>
    %47 = arith.addf %43, %46 : vector<1x128xf32>
    %48 = math.rsqrt %47 : vector<1x128xf32>
    %49 = arith.mulf %44, %48 : vector<1x128xf32>
    %50 = arith.mulf %49, %39 : vector<1x128xf32>
    %51 = arith.subf %45, %50 : vector<1x128xf32>
    %52 = vector.broadcast %49 : vector<1x128xf32> to vector<8x128xf32>
    %53 = arith.mulf %32, %52 : vector<8x128xf32>
    %54 = vector.broadcast %51 : vector<1x128xf32> to vector<8x128xf32>
    %55 = arith.addf %53, %54 : vector<8x128xf32>
    %cst_24 = arith.constant 0.000000e+00 : f32
    %56 = vector.broadcast %cst_24 : f32 to vector<8x128xf32>
    %57 = arith.maximumf %55, %56 : vector<8x128xf32>
    %58 = arith.truncf %57 : vector<8x128xf32> to vector<8x128xbf16>
    %c2_25 = arith.constant 2 : index
    %c0_26 = arith.constant 0 : index
    %c0_27 = arith.constant 0 : index
    %59 = vector.load %arg1[%c2_25, %c0_26, %c0_27] : memref<3x128x128xbf16, #tpu.memory_space<vmem>>, vector<1x128x128xbf16>
    %60 = vector.shape_cast %59 : vector<1x128x128xbf16> to vector<128x128xbf16>
    %cst_28 = arith.constant dense<0.000000e+00> : vector<8x128xf32>
    %61 = tpu.matmul %58, %60, %cst_28 {dimension_numbers = #tpu.dot_dimension_numbers<[1], [0], [0], [1], [0, 0, 1, 1], [], []>} : vector<8x128xbf16>, vector<128x128xbf16>, vector<8x128xf32> -> vector<8x128xf32>
    %cst_29 = arith.constant dense<0.000000e+00> : vector<128xf32>
    %62 = vector.multi_reduction <add>, %61, %cst_29 [0] : vector<8x128xf32> to vector<128xf32>
    %63 = vector.shape_cast %62 : vector<128xf32> to vector<1x128xf32>
    %64 = arith.mulf %61, %61 : vector<8x128xf32>
    %cst_30 = arith.constant dense<0.000000e+00> : vector<128xf32>
    %65 = vector.multi_reduction <add>, %64, %cst_30 [0] : vector<8x128xf32> to vector<128xf32>
    %66 = vector.shape_cast %65 : vector<128xf32> to vector<1x128xf32>
    %cst_31 = arith.constant 1.250000e-01 : f32
    %67 = vector.broadcast %cst_31 : f32 to vector<1x128xf32>
    %68 = arith.mulf %63, %67 : vector<1x128xf32>
    %cst_32 = arith.constant 1.250000e-01 : f32
    %69 = vector.broadcast %cst_32 : f32 to vector<1x128xf32>
    %70 = arith.mulf %66, %69 : vector<1x128xf32>
    %71 = arith.mulf %68, %68 : vector<1x128xf32>
    %72 = arith.subf %70, %71 : vector<1x128xf32>
    %c4 = arith.constant 4 : index
    %c0_33 = arith.constant 0 : index
    %73 = vector.load %arg2[%c4, %c0_33] : memref<6x128xf32, #tpu.memory_space<vmem>>, vector<1x128xf32>
    %c5 = arith.constant 5 : index
    %c0_34 = arith.constant 0 : index
    %74 = vector.load %arg2[%c5, %c0_34] : memref<6x128xf32, #tpu.memory_space<vmem>>, vector<1x128xf32>
    %cst_35 = arith.constant 9.99999974E-6 : f32
    %75 = vector.broadcast %cst_35 : f32 to vector<1x128xf32>
    %76 = arith.addf %72, %75 : vector<1x128xf32>
    %77 = math.rsqrt %76 : vector<1x128xf32>
    %78 = arith.mulf %73, %77 : vector<1x128xf32>
    %79 = arith.mulf %78, %68 : vector<1x128xf32>
    %80 = arith.subf %74, %79 : vector<1x128xf32>
    %81 = vector.broadcast %78 : vector<1x128xf32> to vector<8x128xf32>
    %82 = arith.mulf %61, %81 : vector<8x128xf32>
    %83 = vector.broadcast %80 : vector<1x128xf32> to vector<8x128xf32>
    %84 = arith.addf %82, %83 : vector<8x128xf32>
    %cst_36 = arith.constant 0.000000e+00 : f32
    %85 = vector.broadcast %cst_36 : f32 to vector<8x128xf32>
    %86 = arith.maximumf %84, %85 : vector<8x128xf32>
    %c0_37 = arith.constant 0 : index
    %c0_38 = arith.constant 0 : index
    %87 = vector.load %arg3[%c0_37, %c0_38] : memref<8x128xf32, #tpu.memory_space<vmem>>, vector<8x128xf32>
    tpu.vector_store %arg3[%c0_37, %c0_38], %86 {strides = array<i32>} : memref<8x128xf32, #tpu.memory_space<vmem>>, vector<8x128xf32>,
    return
  }
}

</mosaic_0001>

<bundles_post_ra>
// kernel: mlp_forward.1
= control target key start
LH: loop header
LB: loop body
LE: loop exit
PB: predicated region body
PF: predicated region fallthrough
CT: control target
= control target key end

     0   :  { %8 = vsyncpa [#allocation3], 0  ;;  %s632_s0 = inlined_call_operand.vmem [shape: bf16[8,128], index: 0, kind: input, shape index: {}]   ;;  %s633_s1 = inlined_call_operand.hbm [shape: bf16[3,128,128], index: 1, kind: input, shape index: {}]   ;;  %s634_s2 = inlined_call_operand.vmem [shape: f32[6,128], index: 2, kind: input, shape index: {}]   ;;  %s635_s3 = inlined_call_operand.hbm [shape: f32[8,128], index: 3, kind: output, shape index: {}]  }
   0x1   :  { %9 = vsyncpa [#allocation4], 0  ;;  %s16_s14 = sshll.u32 %s633_s1, 4  ;;  %s581_s15 = smov [#allocation2]   ;;  %s17_s14 = int_to_ptr.hbm [resolvable:$true] %s16_s14 }
   0x2   :  { %s18_s16 = sshll.u32 %s581_s15, 4  ;;  %s582_s17 = smov 64   ;;  %s19_s16 = int_to_ptr.vmem [resolvable:$true] %s18_s16 }
   0x3   :  { %s583_s18 = smov 4  }
   0x4   :  { %24 = dma.hbm_to_vmem [thread:$0]  %s17_s14, 3072, %s19_s16, [#allocation3], %s582_s17, %s582_s17, %s583_s18  }
   0x5   :  { %577 = dma.done.wait [#allocation3], 3072  }
   0x6   :  { %578 = vsyncadd [#allocation3], 4294964224  ;;  %v502_v0 = vld [vmem:[#allocation2 + $0x38] sm:$0xff]  ;;  %v501_v1 = vld [vmem:[#allocation2 + $0x30] sm:$0xff]  ;;  %s584_s4 = smov [#allocation5]   ;;  %s389_s8 = sshll.u32 %s635_s3, 4  ;;  %s390_s8 = int_to_ptr.hbm [resolvable:$true] %s389_s8 }
   0x7   :  { %96 = vmatpush.bf16.msra.mxu0 %v502_v0  ;;  %v500_v2 = vld [vmem:[#allocation2 + $0x28] sm:$0xff]  ;;  %v499_v3 = vld [vmem:[#allocation2 + $0x20] sm:$0xff]  ;;  %v498_v4 = vld [vmem:[#allocation2 + $0x18] sm:$0xff]  ;;  %s387_s5 = sshll.u32 %s584_s4, 4  ;;  %s388_s5 = int_to_ptr.vmem [resolvable:$true] %s387_s5 }
   0x8   :  { %v497_v5 = vld [vmem:[#allocation2 + $0x10] sm:$0xff]  ;;  %v496_v6 = vld [vmem:[#allocation2 + $0x8] sm:$0xff]  ;;  %v495_v7 = vld [vmem:[#allocation2] sm:$0xff] }
   0x9   :  { %v31_v8 = vld [vmem:[%s632_s0] sm:$0xf]  ;;  %v510_v9 = vld [vmem:[#allocation2 + $0x78] sm:$0xff]  ;;  %v509_v10 = vld [vmem:[#allocation2 + $0x70] sm:$0xff] }
   0xa   :  { %213 = vmatpush.bf16.msra.mxu1 %v510_v9  ;;  %v508_v11 = vld [vmem:[#allocation2 + $0x68] sm:$0xff]  ;;  %v507_v12 = vld [vmem:[#allocation2 + $0x60] sm:$0xff]  ;;  %v506_v13 = vld [vmem:[#allocation2 + $0x58] sm:$0xff] }
   0xb   :  { %97 = vmatpush.bf16.msra.mxu0 %v501_v1  ;;  %v505_v17 = vld [vmem:[#allocation2 + $0x50] sm:$0xff]  ;;  %v504_v22 = vld [vmem:[#allocation2 + $0x48] sm:$0xff]  ;;  %v503_v28 = vld [vmem:[#allocation2 + $0x40] sm:$0xff] }
   0xc   :  { %v126_v42 = vld [vmem:[%s634_s2] sm:$0x1]  ;;  %v127_v46 = vld [vmem:[%s634_s2 + $0x1] sm:$0x1]  ;;  %v518_v55 = vld [vmem:[#allocation2 + $0xb8] sm:$0xff] }
   0xd   :  { %330 = vmatpush.bf16.msra.mxu2 %v518_v55  ;;  %v517_v56 = vld [vmem:[#allocation2 + $0xb0] sm:$0xff]  ;;  %v516_v57 = vld [vmem:[#allocation2 + $0xa8] sm:$0xff]  ;;  %v515_v58 = vld [vmem:[#allocation2 + $0xa0] sm:$0xff] }
   0xe   :  { %214 = vmatpush.bf16.msra.mxu1 %v509_v10  ;;  %v514_v59 = vld [vmem:[#allocation2 + $0x98] sm:$0xff]  ;;  %v513_v63 = vld [vmem:[#allocation2 + $0x90] sm:$0xff]  ;;  %v511_v10 = vld [vmem:[#allocation2 + $0x80] sm:$0xff] }
   0xf   :  { %98 = vmatpush.bf16.msra.mxu0 %v500_v2 }
  0x11   :  { %331 = vmatpush.bf16.msra.mxu2 %v517_v56 }
  0x12   :  { %215 = vmatpush.bf16.msra.mxu1 %v508_v11 }
  0x13   :  { %99 = vmatpush.bf16.msra.mxu0 %v499_v3 }
  0x15   :  { %332 = vmatpush.bf16.msra.mxu2 %v516_v57 }
  0x16   :  { %216 = vmatpush.bf16.msra.mxu1 %v507_v12 }
  0x17   :  { %100 = vmatpush.bf16.msra.mxu0 %v498_v4  ;;  %v512_v4 = vld [vmem:[#allocation2 + $0x88] sm:$0xff] }
  0x19   :  { %333 = vmatpush.bf16.msra.mxu2 %v515_v58 }
  0x1a   :  { %217 = vmatpush.bf16.msra.mxu1 %v506_v13 }
  0x1b   :  { %101 = vmatpush.bf16.msra.mxu0 %v497_v5 }
  0x1d   :  { %334 = vmatpush.bf16.msra.mxu2 %v514_v59 }
  0x1e   :  { %218 = vmatpush.bf16.msra.mxu1 %v505_v17 }
  0x1f   :  { %102 = vmatpush.bf16.msra.mxu0 %v496_v6 }
  0x21   :  { %335 = vmatpush.bf16.msra.mxu2 %v513_v63 }
  0x22   :  { %219 = vmatpush.bf16.msra.mxu1 %v504_v22 }
  0x23   :  { %103 = vmatpush.bf16.msra.mxu0 %v495_v7 }
  0x25   :  { %336 = vmatpush.bf16.msra.mxu2 %v512_v4 }
  0x26   :  { %104 = vmatmul.bf16.vlgmr.msra.gmra.mxu0 %v31_v8  ;;  %220 = vmatpush.bf16.msra.mxu1 %v503_v28  ;;  %v244_v28 = vld [vmem:[%s634_s2 + $0x3] sm:$0x1] }
  0x29   :  { %337 = vmatpush.bf16.msra.mxu2 %v511_v10 }
  0xa3   :  { %v105_v14 = vpop.f32.mrf.mxu0 }
  0xa4   :  { %v109_v15 = vrot.slane %v105_v14, 4  ;;  %v115_v16 = vmul.f32 %v105_v14, %v105_v14 }
  0xa6   :  { %v110_v18 = vadd.f32 %v109_v15, %v105_v14  ;;  %v116_v19 = vrot.slane %v115_v16, 4 }
  0xa8   :  { %v111_v20 = vrot.slane %v110_v18, 2  ;;  %v117_v21 = vadd.f32 %v116_v19, %v115_v16 }
  0xaa   :  { %v112_v23 = vadd.f32 %v111_v20, %v110_v18  ;;  %v118_v24 = vrot.slane %v117_v21, 2 }
  0xab   :  { %v107_v25 = vpop.f32.mrf.mxu0 }
  0xac   :  { %v113_v26 = vrot.slane %v112_v23, 1  ;;  %v119_v27 = vadd.f32 %v118_v24, %v117_v21  ;;  %v243_v24 = vld [vmem:[%s634_s2 + $0x2] sm:$0x1] }
  0xae   :  { %v120_v29 = vrot.slane %v119_v27, 1  ;;  %v114_v30 = vadd.f32 %v113_v26, %v112_v23 }
  0xb0   :  { %v121_v31 = vadd.f32 %v120_v29, %v119_v27  ;;  %v122_v32 = vmul.f32 0.125, %v114_v30 }
  0xb2   :  { %v123_v33 = vmul.f32 0.125, %v121_v31  ;;  %v124_v34 = vmul.f32 %v122_v32, %v122_v32 }
  0xb4   :  { %v125_v35 = vsub.f32 %v123_v33, %v124_v34 }
  0xb6   :  { %v128_v36 = vadd.f32 1e-05, %v125_v35 }
  0xb8   :  { %523 = vrsqrt.f32 %v128_v36  ;;  %vm135_vm1 = vweird.f32 %v128_v36 }
  0xbe   :  { %v524_v37 = vpop.eup %523 }
  0xbf   :  { %v130_v38 = vmul.f32 %v524_v37, %v128_v36  ;;  %vm136_vm0 = vweird.f32 %v524_v37 }
  0xc0   :  { %vm137_vm2 = vmor %vm135_vm1, %vm136_vm0 }
  0xc1   :  { %v131_v39 = vmul.f32 %v524_v37, %v130_v38 }
  0xc3   :  { %v132_v40 = vmul.f32 0.5, %v131_v39 }
  0xc5   :  { %v133_v41 = vsub.f32 1.5, %v132_v40 }
  0xc7   :  { %v134_v43 = vmul.f32 %v524_v37, %v133_v41 }
  0xc9   :  { %v138_v44 = vsel %vm137_vm2, %v524_v37, %v134_v43 }
  0xca   :  { %v139_v45 = vmul.f32 %v138_v44, %v126_v42 }
  0xcc   :  { %v140_v47 = vmul.f32 %v139_v45, %v122_v32  ;;  %v142_v48 = vperm.slane %v139_v45, 0 }
  0xce   :  { %v141_v49 = vsub.f32 %v127_v46, %v140_v47  ;;  %v143_v50 = vmul.f32 %v142_v48, %v105_v14 }
  0xd0   :  { %v144_v51 = vperm.slane %v141_v49, 0 }
  0xd2   :  { %v145_v52 = vadd.f32 %v144_v51, %v143_v50 }
  0xd4   :  { %v146_v53 = vmax.f32 %v145_v52, 0.0 }
  0xd6   :  { %v147_v54 = vpack.c.bf16 %v146_v53, %v146_v53 }
  0xd8   :  { %221 = vmatmul.bf16.vlgmr.msra.gmra.mxu1 %v147_v54 }
 0x155   :  { %v222_v60 = vpop.f32.mrf.mxu1 }
 0x156   :  { %v226_v61 = vrot.slane %v222_v60, 4  ;;  %v232_v62 = vmul.f32 %v222_v60, %v222_v60 }
 0x158   :  { %v227_v0 = vadd.f32 %v226_v61, %v222_v60  ;;  %v233_v1 = vrot.slane %v232_v62, 4 }
 0x15a   :  { %v228_v2 = vrot.slane %v227_v0, 2  ;;  %v234_v3 = vadd.f32 %v233_v1, %v232_v62  ;;  %v360_v62 = vld [vmem:[%s634_s2 + $0x4] sm:$0x1] }
 0x15c   :  { %v229_v5 = vadd.f32 %v228_v2, %v227_v0  ;;  %v235_v6 = vrot.slane %v234_v3, 2  ;;  %v361_v2 = vld [vmem:[%s634_s2 + $0x5] sm:$0x1] }
 0x15d   :  { %v224_v7 = vpop.f32.mrf.mxu1 }
 0x15e   :  { %v230_v8 = vrot.slane %v229_v5, 1  ;;  %v236_v9 = vadd.f32 %v235_v6, %v234_v3 }
 0x160   :  { %v237_v11 = vrot.slane %v236_v9, 1  ;;  %v231_v12 = vadd.f32 %v230_v8, %v229_v5 }
 0x162   :  { %v238_v13 = vadd.f32 %v237_v11, %v236_v9  ;;  %v239_v14 = vmul.f32 0.125, %v231_v12 }
 0x164   :  { %v240_v15 = vmul.f32 0.125, %v238_v13  ;;  %v241_v16 = vmul.f32 %v239_v14, %v239_v14 }
 0x166   :  { %v242_v17 = vsub.f32 %v240_v15, %v241_v16 }
 0x168   :  { %v245_v18 = vadd.f32 1e-05, %v242_v17 }
 0x16a   :  { %525 = vrsqrt.f32 %v245_v18  ;;  %vm252_vm4 = vweird.f32 %v245_v18 }
 0x170   :  { %v526_v19 = vpop.eup %525 }
 0x171   :  { %v247_v20 = vmul.f32 %v526_v19, %v245_v18  ;;  %vm253_vm3 = vweird.f32 %v526_v19 }
 0x172   :  { %vm254_vm5 = vmor %vm252_vm4, %vm253_vm3 }
 0x173   :  { %v248_v21 = vmul.f32 %v526_v19, %v247_v20 }
 0x175   :  { %v249_v22 = vmul.f32 0.5, %v248_v21 }
 0x177   :  { %v250_v23 = vsub.f32 1.5, %v249_v22 }
 0x179   :  { %v251_v25 = vmul.f32 %v526_v19, %v250_v23 }
 0x17b   :  { %v255_v26 = vsel %vm254_vm5, %v526_v19, %v251_v25 }
 0x17c   :  { %v256_v27 = vmul.f32 %v255_v26, %v243_v24 }
 0x17e   :  { %v257_v29 = vmul.f32 %v256_v27, %v239_v14  ;;  %v259_v30 = vperm.slane %v256_v27, 0 }
 0x180   :  { %v258_v31 = vsub.f32 %v244_v28, %v257_v29  ;;  %v260_v32 = vmul.f32 %v259_v30, %v222_v60 }
 0x182   :  { %v261_v33 = vperm.slane %v258_v31, 0 }
 0x184   :  { %v262_v34 = vadd.f32 %v261_v33, %v260_v32 }
 0x186   :  { %v263_v35 = vmax.f32 %v262_v34, 0.0 }
 0x188   :  { %v264_v36 = vpack.c.bf16 %v263_v35, %v263_v35 }
 0x18a   :  { %338 = vmatmul.bf16.vlgmr.msra.gmra.mxu2 %v264_v36 }
 0x20d   :  { %v339_v37 = vpop.f32.mrf.mxu2 }
 0x20e   :  { %v343_v38 = vrot.slane %v339_v37, 4  ;;  %v349_v39 = vmul.f32 %v339_v37, %v339_v37 }
 0x210   :  { %v344_v40 = vadd.f32 %v343_v38, %v339_v37  ;;  %v350_v41 = vrot.slane %v349_v39, 4 }
 0x212   :  { %v345_v42 = vrot.slane %v344_v40, 2  ;;  %v351_v43 = vadd.f32 %v350_v41, %v349_v39 }
 0x214   :  { %v346_v44 = vadd.f32 %v345_v42, %v344_v40  ;;  %v352_v45 = vrot.slane %v351_v43, 2 }
 0x215   :  { %v341_v46 = vpop.f32.mrf.mxu2 }
 0x216   :  { %v347_v47 = vrot.slane %v346_v44, 1  ;;  %v353_v48 = vadd.f32 %v352_v45, %v351_v43 }
 0x218   :  { %v348_v49 = vadd.f32 %v347_v47, %v346_v44  ;;  %v354_v50 = vrot.slane %v353_v48, 1 }
 0x21a   :  { %v355_v51 = vadd.f32 %v354_v50, %v353_v48  ;;  %v356_v52 = vmul.f32 0.125, %v348_v49 }
 0x21c   :  { %v357_v53 = vmul.f32 0.125, %v355_v51  ;;  %v358_v54 = vmul.f32 %v356_v52, %v356_v52 }
 0x21e   :  { %v359_v55 = vsub.f32 %v357_v53, %v358_v54 }
 0x220   :  { %v362_v56 = vadd.f32 1e-05, %v359_v55 }
 0x222   :  { %527 = vrsqrt.f32 %v362_v56  ;;  %vm369_vm7 = vweird.f32 %v362_v56 }
 0x228   :  { %v528_v57 = vpop.eup %527 }
 0x229   :  { %v364_v58 = vmul.f32 %v528_v57, %v362_v56  ;;  %vm370_vm6 = vweird.f32 %v528_v57 }
 0x22a   :  { %vm371_vm8 = vmor %vm369_vm7, %vm370_vm6 }
 0x22b   :  { %v365_v59 = vmul.f32 %v528_v57, %v364_v58 }
 0x22d   :  { %v366_v60 = vmul.f32 0.5, %v365_v59 }
 0x22f   :  { %v367_v61 = vsub.f32 1.5, %v366_v60 }
 0x231   :  { %v368_v63 = vmul.f32 %v528_v57, %v367_v61 }
 0x233   :  { %v372_v0 = vsel %vm371_vm8, %v528_v57, %v368_v63 }
 0x234   :  { %v373_v1 = vmul.f32 %v372_v0, %v360_v62 }
 0x236   :  { %v376_v3 = vperm.slane %v373_v1, 0  ;;  %v374_v4 = vmul.f32 %v373_v1, %v356_v52 }
 0x238   :  { %v375_v5 = vsub.f32 %v361_v2, %v374_v4  ;;  %v377_v6 = vmul.f32 %v376_v3, %v339_v37 }
 0x23a   :  { %v378_v7 = vperm.slane %v375_v5, 0 }
 0x23c   :  { %v379_v8 = vadd.f32 %v378_v7, %v377_v6 }
 0x23e   :  { %v380_v9 = vmax.f32 %v379_v8, 0.0 }
 0x240   :  { %381 = vst [vmem:[#allocation5] sm:$0xff] %v380_v9 }
 0x241   :  { %392 = dma.vmem_to_hbm [thread:$0]  %s388_s5, 128, %s390_s8, [#allocation4]  }
 0x242   :  { %579 = dma.done.wait [#allocation4], 128  }
 0x243   :  { %580 = vsyncadd [#allocation4], 4294967168 }
 0x244   :  { %397 = vsyncpa [#allocation3], 1 }
 0x245   :  { %398 = vsyncpa [#allocation4], 1 }

</bundles_post_ra>
